<compile_context>
chip_gen: v5e
topology: v5e:2x2
jax: 0.10.0
libtpu: 0.0.40
codegen_flags: <defaults>
</compile_context>

<pallas_src>
import jax
import jax.numpy as jnp
import numpy as np
from jax.experimental import pallas as pl
from jax.experimental.pallas import tpu as pltpu


def _make_gather_kernel(batch, rows_per_step):
    R = rows_per_step

    def kernel(idx_ref, h_hbm, out_ref, vbuf, sems):
        # idx_ref : (B_pad,) int32 in SMEM -- gather position per output row
        # h_hbm   : (B, S, H) hidden_states left in HBM (memory_space=pl.ANY)
        # out_ref : (R, H) VMEM output block
        # vbuf    : (R, H) VMEM scratch (DMA landing buffer)
        # sems    : (R,)  DMA semaphores, one per in-flight row copy
        g = pl.program_id(0)
        base = g * R

        copies = []
        # Issue all R row gathers before waiting -> R DMAs in flight.
        for r in range(R):                           # static unroll, R is tiny
            row = base + r
            b = jnp.minimum(row, batch - 1)          # clamp padded tail rows
            s = idx_ref[row]
            cp = pltpu.make_async_copy(
                h_hbm.at[b, pl.ds(s, 1), :],         # (1, H) source row in HBM
                vbuf.at[pl.ds(r, 1), :],             # (1, H) dest sublane in VMEM
                sems.at[r])
            cp.start()
            copies.append(cp)
        for cp in copies:
            cp.wait()

        # One dense (R, H) store -> sublane/lane dense vst, full-tile writeback.
        out_ref[...] = vbuf[...]

    return kernel


def last_token_pooling(hidden_states, input_ids, attention_mask, eos_token_id,
                       *, validate=True):
    B, S, H = hidden_states.shape
    dtype = hidden_states.dtype
    itemsize = jnp.dtype(dtype).itemsize

    input_ids = input_ids.astype(jnp.int32)
    attention_mask = attention_mask.astype(jnp.int32)

    seq_lens = jnp.sum(attention_mask, axis=-1) - 1                  # (B,)
    # torch advanced indexing wraps negative indices -> use mod S.
    gather_idx = (seq_lens % S).astype(jnp.int32)
    prev_idx = ((seq_lens - 1) % S).astype(jnp.int32)

    # Rows per grid step: native sublane tile (8 for f32, 16 for bf16, ...).
    R = max(8, 32 // itemsize)
    n_steps = int(pl.cdiv(B, R))
    B_pad = n_steps * R
    idx_padded = jnp.pad(gather_idx, (0, B_pad - B))                 # pad with 0 (valid)

    kernel = _make_gather_kernel(B, R)
    emb_padded = pl.pallas_call(
        kernel,
        out_shape=jax.ShapeDtypeStruct((B_pad, H), dtype),
        grid_spec=pltpu.PrefetchScalarGridSpec(
            num_scalar_prefetch=1,
            grid=(n_steps,),
            in_specs=[pl.BlockSpec(memory_space=pl.ANY)],            # raw HBM ref
            out_specs=pl.BlockSpec((R, H), lambda g, idx: (g, 0)),
            scratch_shapes=[
                pltpu.VMEM((R, H), dtype),
                pltpu.SemaphoreType.DMA((R,)),
            ]),
        compiler_params=pltpu.CompilerParams(
            dimension_semantics=("parallel",)),
        cost_estimate=pl.CostEstimate(
            flops=0, transcendentals=0,
            bytes_accessed=2 * B_pad * H * itemsize + B_pad * 4),
    )(idx_padded, hidden_states)
    emb = emb_padded[:B]

    if validate:
        # Fused gather for both checks + ONE packed host sync (kernel already
        # dispatched asynchronously above, so this sync overlaps the gather).
        # TODO(synk): the ValueError semantics force one device->host sync; pass
        # validate=False (or return the flags) for fully async/jit-friendly use.
        pair_idx = jnp.stack([gather_idx, prev_idx], axis=1)          # (B, 2)
        toks = jnp.take_along_axis(input_ids, pair_idx, axis=1)       # (B, 2)
        flags = np.asarray(jax.device_get(jnp.stack([
            jnp.any(toks[:, 0] != eos_token_id),
            jnp.any(toks[:, 1] == eos_token_id)])))
        if bool(flags[0]):
            raise ValueError("The last token of the input_ids is not the eos token")
        if bool(flags[1]):
            raise ValueError("The second to last token of the input_ids is the eos token")

    return emb


if __name__ == "__main__":
    key = jax.random.PRNGKey(0)
    B, S, H = 10, 16, 128                 # H multiple of 128 -> lane-dense stores
    eos_token_id = 2

    k1, k2 = jax.random.split(key)
    hidden_states = jax.random.normal(k1, (B, S, H), dtype=jnp.float32)

    # Per-row valid lengths; eos exactly at the last valid position, never at
    # the second-to-last one (random ids are drawn from [3, 100)).
    lengths = np.array([5, 16, 1, 9, 12, 3, 16, 7, 2, 11], dtype=np.int32)
    ids = np.array(jax.random.randint(k2, (B, S), 3, 100, dtype=jnp.int32))
    mask = np.zeros((B, S), dtype=np.int32)
    for b in range(B):
        mask[b, :lengths[b]] = 1
        ids[b, lengths[b] - 1] = eos_token_id
    input_ids = jnp.asarray(ids)
    attention_mask = jnp.asarray(mask)

    emb = last_token_pooling(hidden_states, input_ids, attention_mask,
                             eos_token_id)
    emb = jax.block_until_ready(emb)

    # Pure-JAX / numpy reference check (exact gather -> exact match).
    seq_lens_ref = np.asarray(attention_mask).sum(-1) - 1
    ref = np.asarray(hidden_states)[np.arange(B), seq_lens_ref]
    np.testing.assert_allclose(np.asarray(emb), ref, rtol=0, atol=0)

    print("KERNEL_OK")
</pallas_src>

<mosaic_0001>
module attributes {stable_mosaic.version = 11 : i64} {
  func.func @kernel(%arg0: i32, %arg1: memref<16xi32, #tpu.memory_space<smem>>, %arg2: memref<10x16x128xf32, #tpu.memory_space<any>>, %arg3: memref<8x128xf32, #tpu.memory_space<vmem>>, %arg4: memref<8x128xf32, #tpu.memory_space<vmem>>, %arg5: memref<8x!tpu.dma_semaphore, #tpu.memory_space<semaphore_mem>>) attributes {dimension_semantics = [#tpu.dimension_semantics<parallel>], iteration_bounds = array<i64: 2>, scalar_prefetch = 1 : i64, scratch_operands = 2 : i64, tpu.core_type = #tpu.core_type<tc>, window_params = [{}, {transform_indices = @transform_1, window_bounds = array<i64: 8, 128>}]} {
    %c8_i32 = arith.constant 8 : i32
    %0 = arith.muli %arg0, %c8_i32 : i32
    %c0_i32 = arith.constant 0 : i32
    %1 = arith.addi %0, %c0_i32 : i32
    %c9_i32 = arith.constant 9 : i32
    %2 = arith.minsi %1, %c9_i32 : i32
    %3 = arith.index_cast %1 : i32 to index
    %4 = memref.load %arg1[%3] : memref<16xi32, #tpu.memory_space<smem>>
    %c0_i32_0 = arith.constant 0 : i32
    %c0_i32_1 = arith.constant 0 : i32
    %5 = tpu.memref_slice %arg2[%2, %4, %c0_i32_1] : memref<10x16x128xf32, #tpu.memory_space<any>> -> memref<1x1x128xf32, #tpu.memory_space<any>>
    %6 = tpu.memref_squeeze %5 : memref<1x1x128xf32, #tpu.memory_space<any>> -> memref<1x128xf32, #tpu.memory_space<any>>
    %c0_i32_2 = arith.constant 0 : i32
    %c0_i32_3 = arith.constant 0 : i32
    %7 = tpu.memref_slice %arg4[%c0_i32_2, %c0_i32_3] : memref<8x128xf32, #tpu.memory_space<vmem>> -> memref<1x128xf32, #tpu.memory_space<vmem>>
    %8 = tpu.memref_slice %arg5[%c0_i32_0] : memref<8x!tpu.dma_semaphore, #tpu.memory_space<semaphore_mem>> -> memref<1x!tpu.dma_semaphore, #tpu.memory_space<semaphore_mem>>
    %9 = tpu.memref_squeeze %8 : memref<1x!tpu.dma_semaphore, #tpu.memory_space<semaphore_mem>> -> memref<!tpu.dma_semaphore, #tpu.memory_space<semaphore_mem>>
    tpu.enqueue_dma source(%6 : memref<1x128xf32, #tpu.memory_space<any>>) target(%7 : memref<1x128xf32, #tpu.memory_space<vmem>>) target_semaphore(%9 : memref<!tpu.dma_semaphore, #tpu.memory_space<semaphore_mem>>)
    %c1_i32 = arith.constant 1 : i32
    %10 = arith.addi %0, %c1_i32 : i32
    %c9_i32_4 = arith.constant 9 : i32
    %11 = arith.minsi %10, %c9_i32_4 : i32
    %12 = arith.index_cast %10 : i32 to index
    %13 = memref.load %arg1[%12] : memref<16xi32, #tpu.memory_space<smem>>
    %c1_i32_5 = arith.constant 1 : i32
    %c0_i32_6 = arith.constant 0 : i32
    %14 = tpu.memref_slice %arg2[%11, %13, %c0_i32_6] : memref<10x16x128xf32, #tpu.memory_space<any>> -> memref<1x1x128xf32, #tpu.memory_space<any>>
    %15 = tpu.memref_squeeze %14 : memref<1x1x128xf32, #tpu.memory_space<any>> -> memref<1x128xf32, #tpu.memory_space<any>>
    %c1_i32_7 = arith.constant 1 : i32
    %c0_i32_8 = arith.constant 0 : i32
    %16 = tpu.memref_slice %arg4[%c1_i32_7, %c0_i32_8] : memref<8x128xf32, #tpu.memory_space<vmem>> -> memref<1x128xf32, #tpu.memory_space<vmem>>
    %17 = tpu.memref_slice %arg5[%c1_i32_5] : memref<8x!tpu.dma_semaphore, #tpu.memory_space<semaphore_mem>> -> memref<1x!tpu.dma_semaphore, #tpu.memory_space<semaphore_mem>>
    %18 = tpu.memref_squeeze %17 : memref<1x!tpu.dma_semaphore, #tpu.memory_space<semaphore_mem>> -> memref<!tpu.dma_semaphore, #tpu.memory_space<semaphore_mem>>
    tpu.enqueue_dma source(%15 : memref<1x128xf32, #tpu.memory_space<any>>) target(%16 : memref<1x128xf32, #tpu.memory_space<vmem>>) target_semaphore(%18 : memref<!tpu.dma_semaphore, #tpu.memory_space<semaphore_mem>>)
    %c2_i32 = arith.constant 2 : i32
    %19 = arith.addi %0, %c2_i32 : i32
    %c9_i32_9 = arith.constant 9 : i32
    %20 = arith.minsi %19, %c9_i32_9 : i32
    %21 = arith.index_cast %19 : i32 to index
    %22 = memref.load %arg1[%21] : memref<16xi32, #tpu.memory_space<smem>>
    %c2_i32_10 = arith.constant 2 : i32
    %c0_i32_11 = arith.constant 0 : i32
    %23 = tpu.memref_slice %arg2[%20, %22, %c0_i32_11] : memref<10x16x128xf32, #tpu.memory_space<any>> -> memref<1x1x128xf32, #tpu.memory_space<any>>
    %24 = tpu.memref_squeeze %23 : memref<1x1x128xf32, #tpu.memory_space<any>> -> memref<1x128xf32, #tpu.memory_space<any>>
    %c2_i32_12 = arith.constant 2 : i32
    %c0_i32_13 = arith.constant 0 : i32
    %25 = tpu.memref_slice %arg4[%c2_i32_12, %c0_i32_13] : memref<8x128xf32, #tpu.memory_space<vmem>> -> memref<1x128xf32, #tpu.memory_space<vmem>>
    %26 = tpu.memref_slice %arg5[%c2_i32_10] : memref<8x!tpu.dma_semaphore, #tpu.memory_space<semaphore_mem>> -> memref<1x!tpu.dma_semaphore, #tpu.memory_space<semaphore_mem>>
    %27 = tpu.memref_squeeze %26 : memref<1x!tpu.dma_semaphore, #tpu.memory_space<semaphore_mem>> -> memref<!tpu.dma_semaphore, #tpu.memory_space<semaphore_mem>>
    tpu.enqueue_dma source(%24 : memref<1x128xf32, #tpu.memory_space<any>>) target(%25 : memref<1x128xf32, #tpu.memory_space<vmem>>) target_semaphore(%27 : memref<!tpu.dma_semaphore, #tpu.memory_space<semaphore_mem>>)
    %c3_i32 = arith.constant 3 : i32
    %28 = arith.addi %0, %c3_i32 : i32
    %c9_i32_14 = arith.constant 9 : i32
    %29 = arith.minsi %28, %c9_i32_14 : i32
    %30 = arith.index_cast %28 : i32 to index
    %31 = memref.load %arg1[%30] : memref<16xi32, #tpu.memory_space<smem>>
    %c3_i32_15 = arith.constant 3 : i32
    %c0_i32_16 = arith.constant 0 : i32
    %32 = tpu.memref_slice %arg2[%29, %31, %c0_i32_16] : memref<10x16x128xf32, #tpu.memory_space<any>> -> memref<1x1x128xf32, #tpu.memory_space<any>>
    %33 = tpu.memref_squeeze %32 : memref<1x1x128xf32, #tpu.memory_space<any>> -> memref<1x128xf32, #tpu.memory_space<any>>
    %c3_i32_17 = arith.constant 3 : i32
    %c0_i32_18 = arith.constant 0 : i32
    %34 = tpu.memref_slice %arg4[%c3_i32_17, %c0_i32_18] : memref<8x128xf32, #tpu.memory_space<vmem>> -> memref<1x128xf32, #tpu.memory_space<vmem>>
    %35 = tpu.memref_slice %arg5[%c3_i32_15] : memref<8x!tpu.dma_semaphore, #tpu.memory_space<semaphore_mem>> -> memref<1x!tpu.dma_semaphore, #tpu.memory_space<semaphore_mem>>
    %36 = tpu.memref_squeeze %35 : memref<1x!tpu.dma_semaphore, #tpu.memory_space<semaphore_mem>> -> memref<!tpu.dma_semaphore, #tpu.memory_space<semaphore_mem>>
    tpu.enqueue_dma source(%33 : memref<1x128xf32, #tpu.memory_space<any>>) target(%34 : memref<1x128xf32, #tpu.memory_space<vmem>>) target_semaphore(%36 : memref<!tpu.dma_semaphore, #tpu.memory_space<semaphore_mem>>)
    %c4_i32 = arith.constant 4 : i32
    %37 = arith.addi %0, %c4_i32 : i32
    %c9_i32_19 = arith.constant 9 : i32
    %38 = arith.minsi %37, %c9_i32_19 : i32
    %39 = arith.index_cast %37 : i32 to index
    %40 = memref.load %arg1[%39] : memref<16xi32, #tpu.memory_space<smem>>
    %c4_i32_20 = arith.constant 4 : i32
    %c0_i32_21 = arith.constant 0 : i32
    %41 = tpu.memref_slice %arg2[%38, %40, %c0_i32_21] : memref<10x16x128xf32, #tpu.memory_space<any>> -> memref<1x1x128xf32, #tpu.memory_space<any>>
    %42 = tpu.memref_squeeze %41 : memref<1x1x128xf32, #tpu.memory_space<any>> -> memref<1x128xf32, #tpu.memory_space<any>>
    %c4_i32_22 = arith.constant 4 : i32
    %c0_i32_23 = arith.constant 0 : i32
    %43 = tpu.memref_slice %arg4[%c4_i32_22, %c0_i32_23] : memref<8x128xf32, #tpu.memory_space<vmem>> -> memref<1x128xf32, #tpu.memory_space<vmem>>
    %44 = tpu.memref_slice %arg5[%c4_i32_20] : memref<8x!tpu.dma_semaphore, #tpu.memory_space<semaphore_mem>> -> memref<1x!tpu.dma_semaphore, #tpu.memory_space<semaphore_mem>>
    %45 = tpu.memref_squeeze %44 : memref<1x!tpu.dma_semaphore, #tpu.memory_space<semaphore_mem>> -> memref<!tpu.dma_semaphore, #tpu.memory_space<semaphore_mem>>
    tpu.enqueue_dma source(%42 : memref<1x128xf32, #tpu.memory_space<any>>) target(%43 : memref<1x128xf32, #tpu.memory_space<vmem>>) target_semaphore(%45 : memref<!tpu.dma_semaphore, #tpu.memory_space<semaphore_mem>>)
    %c5_i32 = arith.constant 5 : i32
    %46 = arith.addi %0, %c5_i32 : i32
    %c9_i32_24 = arith.constant 9 : i32
    %47 = arith.minsi %46, %c9_i32_24 : i32
    %48 = arith.index_cast %46 : i32 to index
    %49 = memref.load %arg1[%48] : memref<16xi32, #tpu.memory_space<smem>>
    %c5_i32_25 = arith.constant 5 : i32
    %c0_i32_26 = arith.constant 0 : i32
    %50 = tpu.memref_slice %arg2[%47, %49, %c0_i32_26] : memref<10x16x128xf32, #tpu.memory_space<any>> -> memref<1x1x128xf32, #tpu.memory_space<any>>
    %51 = tpu.memref_squeeze %50 : memref<1x1x128xf32, #tpu.memory_space<any>> -> memref<1x128xf32, #tpu.memory_space<any>>
    %c5_i32_27 = arith.constant 5 : i32
    %c0_i32_28 = arith.constant 0 : i32
    %52 = tpu.memref_slice %arg4[%c5_i32_27, %c0_i32_28] : memref<8x128xf32, #tpu.memory_space<vmem>> -> memref<1x128xf32, #tpu.memory_space<vmem>>
    %53 = tpu.memref_slice %arg5[%c5_i32_25] : memref<8x!tpu.dma_semaphore, #tpu.memory_space<semaphore_mem>> -> memref<1x!tpu.dma_semaphore, #tpu.memory_space<semaphore_mem>>
    %54 = tpu.memref_squeeze %53 : memref<1x!tpu.dma_semaphore, #tpu.memory_space<semaphore_mem>> -> memref<!tpu.dma_semaphore, #tpu.memory_space<semaphore_mem>>
    tpu.enqueue_dma source(%51 : memref<1x128xf32, #tpu.memory_space<any>>) target(%52 : memref<1x128xf32, #tpu.memory_space<vmem>>) target_semaphore(%54 : memref<!tpu.dma_semaphore, #tpu.memory_space<semaphore_mem>>)
    %c6_i32 = arith.constant 6 : i32
    %55 = arith.addi %0, %c6_i32 : i32
    %c9_i32_29 = arith.constant 9 : i32
    %56 = arith.minsi %55, %c9_i32_29 : i32
    %57 = arith.index_cast %55 : i32 to index
    %58 = memref.load %arg1[%57] : memref<16xi32, #tpu.memory_space<smem>>
    %c6_i32_30 = arith.constant 6 : i32
    %c0_i32_31 = arith.constant 0 : i32
    %59 = tpu.memref_slice %arg2[%56, %58, %c0_i32_31] : memref<10x16x128xf32, #tpu.memory_space<any>> -> memref<1x1x128xf32, #tpu.memory_space<any>>
    %60 = tpu.memref_squeeze %59 : memref<1x1x128xf32, #tpu.memory_space<any>> -> memref<1x128xf32, #tpu.memory_space<any>>
    %c6_i32_32 = arith.constant 6 : i32
    %c0_i32_33 = arith.constant 0 : i32
    %61 = tpu.memref_slice %arg4[%c6_i32_32, %c0_i32_33] : memref<8x128xf32, #tpu.memory_space<vmem>> -> memref<1x128xf32, #tpu.memory_space<vmem>>
    %62 = tpu.memref_slice %arg5[%c6_i32_30] : memref<8x!tpu.dma_semaphore, #tpu.memory_space<semaphore_mem>> -> memref<1x!tpu.dma_semaphore, #tpu.memory_space<semaphore_mem>>
    %63 = tpu.memref_squeeze %62 : memref<1x!tpu.dma_semaphore, #tpu.memory_space<semaphore_mem>> -> memref<!tpu.dma_semaphore, #tpu.memory_space<semaphore_mem>>
    tpu.enqueue_dma source(%60 : memref<1x128xf32, #tpu.memory_space<any>>) target(%61 : memref<1x128xf32, #tpu.memory_space<vmem>>) target_semaphore(%63 : memref<!tpu.dma_semaphore, #tpu.memory_space<semaphore_mem>>)
    %c7_i32 = arith.constant 7 : i32
    %64 = arith.addi %0, %c7_i32 : i32
    %c9_i32_34 = arith.constant 9 : i32
    %65 = arith.minsi %64, %c9_i32_34 : i32
    %66 = arith.index_cast %64 : i32 to index
    %67 = memref.load %arg1[%66] : memref<16xi32, #tpu.memory_space<smem>>
    %c7_i32_35 = arith.constant 7 : i32
    %c0_i32_36 = arith.constant 0 : i32
    %68 = tpu.memref_slice %arg2[%65, %67, %c0_i32_36] : memref<10x16x128xf32, #tpu.memory_space<any>> -> memref<1x1x128xf32, #tpu.memory_space<any>>
    %69 = tpu.memref_squeeze %68 : memref<1x1x128xf32, #tpu.memory_space<any>> -> memref<1x128xf32, #tpu.memory_space<any>>
    %c7_i32_37 = arith.constant 7 : i32
    %c0_i32_38 = arith.constant 0 : i32
    %70 = tpu.memref_slice %arg4[%c7_i32_37, %c0_i32_38] : memref<8x128xf32, #tpu.memory_space<vmem>> -> memref<1x128xf32, #tpu.memory_space<vmem>>
    %71 = tpu.memref_slice %arg5[%c7_i32_35] : memref<8x!tpu.dma_semaphore, #tpu.memory_space<semaphore_mem>> -> memref<1x!tpu.dma_semaphore, #tpu.memory_space<semaphore_mem>>
    %72 = tpu.memref_squeeze %71 : memref<1x!tpu.dma_semaphore, #tpu.memory_space<semaphore_mem>> -> memref<!tpu.dma_semaphore, #tpu.memory_space<semaphore_mem>>
    tpu.enqueue_dma source(%69 : memref<1x128xf32, #tpu.memory_space<any>>) target(%70 : memref<1x128xf32, #tpu.memory_space<vmem>>) target_semaphore(%72 : memref<!tpu.dma_semaphore, #tpu.memory_space<semaphore_mem>>)
    %c0_i32_39 = arith.constant 0 : i32
    %c0_i32_40 = arith.constant 0 : i32
    %73 = tpu.memref_slice %arg2[%2, %4, %c0_i32_40] : memref<10x16x128xf32, #tpu.memory_space<any>> -> memref<1x1x128xf32, #tpu.memory_space<any>>
    %74 = tpu.memref_squeeze %73 : memref<1x1x128xf32, #tpu.memory_space<any>> -> memref<1x128xf32, #tpu.memory_space<any>>
    %c0_i32_41 = arith.constant 0 : i32
    %c0_i32_42 = arith.constant 0 : i32
    %75 = tpu.memref_slice %arg4[%c0_i32_41, %c0_i32_42] : memref<8x128xf32, #tpu.memory_space<vmem>> -> memref<1x128xf32, #tpu.memory_space<vmem>>
    %76 = tpu.memref_slice %arg5[%c0_i32_39] : memref<8x!tpu.dma_semaphore, #tpu.memory_space<semaphore_mem>> -> memref<1x!tpu.dma_semaphore, #tpu.memory_space<semaphore_mem>>
    %77 = tpu.memref_squeeze %76 : memref<1x!tpu.dma_semaphore, #tpu.memory_space<semaphore_mem>> -> memref<!tpu.dma_semaphore, #tpu.memory_space<semaphore_mem>>
    tpu.wait_dma2 semaphore(%77 : memref<!tpu.dma_semaphore, #tpu.memory_space<semaphore_mem>>) src(%74 : memref<1x128xf32, #tpu.memory_space<any>>) dst(%75 : memref<1x128xf32, #tpu.memory_space<vmem>>)
    %c1_i32_43 = arith.constant 1 : i32
    %c0_i32_44 = arith.constant 0 : i32
    %78 = tpu.memref_slice %arg2[%11, %13, %c0_i32_44] : memref<10x16x128xf32, #tpu.memory_space<any>> -> memref<1x1x128xf32, #tpu.memory_space<any>>
    %79 = tpu.memref_squeeze %78 : memref<1x1x128xf32, #tpu.memory_space<any>> -> memref<1x128xf32, #tpu.memory_space<any>>
    %c1_i32_45 = arith.constant 1 : i32
    %c0_i32_46 = arith.constant 0 : i32
    %80 = tpu.memref_slice %arg4[%c1_i32_45, %c0_i32_46] : memref<8x128xf32, #tpu.memory_space<vmem>> -> memref<1x128xf32, #tpu.memory_space<vmem>>
    %81 = tpu.memref_slice %arg5[%c1_i32_43] : memref<8x!tpu.dma_semaphore, #tpu.memory_space<semaphore_mem>> -> memref<1x!tpu.dma_semaphore, #tpu.memory_space<semaphore_mem>>
    %82 = tpu.memref_squeeze %81 : memref<1x!tpu.dma_semaphore, #tpu.memory_space<semaphore_mem>> -> memref<!tpu.dma_semaphore, #tpu.memory_space<semaphore_mem>>
    tpu.wait_dma2 semaphore(%82 : memref<!tpu.dma_semaphore, #tpu.memory_space<semaphore_mem>>) src(%79 : memref<1x128xf32, #tpu.memory_space<any>>) dst(%80 : memref<1x128xf32, #tpu.memory_space<vmem>>)
    %c2_i32_47 = arith.constant 2 : i32
    %c0_i32_48 = arith.constant 0 : i32
    %83 = tpu.memref_slice %arg2[%20, %22, %c0_i32_48] : memref<10x16x128xf32, #tpu.memory_space<any>> -> memref<1x1x128xf32, #tpu.memory_space<any>>
    %84 = tpu.memref_squeeze %83 : memref<1x1x128xf32, #tpu.memory_space<any>> -> memref<1x128xf32, #tpu.memory_space<any>>
    %c2_i32_49 = arith.constant 2 : i32
    %c0_i32_50 = arith.constant 0 : i32
    %85 = tpu.memref_slice %arg4[%c2_i32_49, %c0_i32_50] : memref<8x128xf32, #tpu.memory_space<vmem>> -> memref<1x128xf32, #tpu.memory_space<vmem>>
    %86 = tpu.memref_slice %arg5[%c2_i32_47] : memref<8x!tpu.dma_semaphore, #tpu.memory_space<semaphore_mem>> -> memref<1x!tpu.dma_semaphore, #tpu.memory_space<semaphore_mem>>
    %87 = tpu.memref_squeeze %86 : memref<1x!tpu.dma_semaphore, #tpu.memory_space<semaphore_mem>> -> memref<!tpu.dma_semaphore, #tpu.memory_space<semaphore_mem>>
    tpu.wait_dma2 semaphore(%87 : memref<!tpu.dma_semaphore, #tpu.memory_space<semaphore_mem>>) src(%84 : memref<1x128xf32, #tpu.memory_space<any>>) dst(%85 : memref<1x128xf32, #tpu.memory_space<vmem>>)
    %c3_i32_51 = arith.constant 3 : i32
    %c0_i32_52 = arith.constant 0 : i32
    %88 = tpu.memref_slice %arg2[%29, %31, %c0_i32_52] : memref<10x16x128xf32, #tpu.memory_space<any>> -> memref<1x1x128xf32, #tpu.memory_space<any>>
    %89 = tpu.memref_squeeze %88 : memref<1x1x128xf32, #tpu.memory_space<any>> -> memref<1x128xf32, #tpu.memory_space<any>>
    %c3_i32_53 = arith.constant 3 : i32
    %c0_i32_54 = arith.constant 0 : i32
    %90 = tpu.memref_slice %arg4[%c3_i32_53, %c0_i32_54] : memref<8x128xf32, #tpu.memory_space<vmem>> -> memref<1x128xf32, #tpu.memory_space<vmem>>
    %91 = tpu.memref_slice %arg5[%c3_i32_51] : memref<8x!tpu.dma_semaphore, #tpu.memory_space<semaphore_mem>> -> memref<1x!tpu.dma_semaphore, #tpu.memory_space<semaphore_mem>>
    %92 = tpu.memref_squeeze %91 : memref<1x!tpu.dma_semaphore, #tpu.memory_space<semaphore_mem>> -> memref<!tpu.dma_semaphore, #tpu.memory_space<semaphore_mem>>
    tpu.wait_dma2 semaphore(%92 : memref<!tpu.dma_semaphore, #tpu.memory_space<semaphore_mem>>) src(%89 : memref<1x128xf32, #tpu.memory_space<any>>) dst(%90 : memref<1x128xf32, #tpu.memory_space<vmem>>)
    %c4_i32_55 = arith.constant 4 : i32
    %c0_i32_56 = arith.constant 0 : i32
    %93 = tpu.memref_slice %arg2[%38, %40, %c0_i32_56] : memref<10x16x128xf32, #tpu.memory_space<any>> -> memref<1x1x128xf32, #tpu.memory_space<any>>
    %94 = tpu.memref_squeeze %93 : memref<1x1x128xf32, #tpu.memory_space<any>> -> memref<1x128xf32, #tpu.memory_space<any>>
    %c4_i32_57 = arith.constant 4 : i32
    %c0_i32_58 = arith.constant 0 : i32
    %95 = tpu.memref_slice %arg4[%c4_i32_57, %c0_i32_58] : memref<8x128xf32, #tpu.memory_space<vmem>> -> memref<1x128xf32, #tpu.memory_space<vmem>>
    %96 = tpu.memref_slice %arg5[%c4_i32_55] : memref<8x!tpu.dma_semaphore, #tpu.memory_space<semaphore_mem>> -> memref<1x!tpu.dma_semaphore, #tpu.memory_space<semaphore_mem>>
    %97 = tpu.memref_squeeze %96 : memref<1x!tpu.dma_semaphore, #tpu.memory_space<semaphore_mem>> -> memref<!tpu.dma_semaphore, #tpu.memory_space<semaphore_mem>>
    tpu.wait_dma2 semaphore(%97 : memref<!tpu.dma_semaphore, #tpu.memory_space<semaphore_mem>>) src(%94 : memref<1x128xf32, #tpu.memory_space<any>>) dst(%95 : memref<1x128xf32, #tpu.memory_space<vmem>>)
    %c5_i32_59 = arith.constant 5 : i32
    %c0_i32_60 = arith.constant 0 : i32
    %98 = tpu.memref_slice %arg2[%47, %49, %c0_i32_60] : memref<10x16x128xf32, #tpu.memory_space<any>> -> memref<1x1x128xf32, #tpu.memory_space<any>>
    %99 = tpu.memref_squeeze %98 : memref<1x1x128xf32, #tpu.memory_space<any>> -> memref<1x128xf32, #tpu.memory_space<any>>
    %c5_i32_61 = arith.constant 5 : i32
    %c0_i32_62 = arith.constant 0 : i32
    %100 = tpu.memref_slice %arg4[%c5_i32_61, %c0_i32_62] : memref<8x128xf32, #tpu.memory_space<vmem>> -> memref<1x128xf32, #tpu.memory_space<vmem>>
    %101 = tpu.memref_slice %arg5[%c5_i32_59] : memref<8x!tpu.dma_semaphore, #tpu.memory_space<semaphore_mem>> -> memref<1x!tpu.dma_semaphore, #tpu.memory_space<semaphore_mem>>
    %102 = tpu.memref_squeeze %101 : memref<1x!tpu.dma_semaphore, #tpu.memory_space<semaphore_mem>> -> memref<!tpu.dma_semaphore, #tpu.memory_space<semaphore_mem>>
    tpu.wait_dma2 semaphore(%102 : memref<!tpu.dma_semaphore, #tpu.memory_space<semaphore_mem>>) src(%99 : memref<1x128xf32, #tpu.memory_space<any>>) dst(%100 : memref<1x128xf32, #tpu.memory_space<vmem>>)
    %c6_i32_63 = arith.constant 6 : i32
    %c0_i32_64 = arith.constant 0 : i32
    %103 = tpu.memref_slice %arg2[%56, %58, %c0_i32_64] : memref<10x16x128xf32, #tpu.memory_space<any>> -> memref<1x1x128xf32, #tpu.memory_space<any>>
    %104 = tpu.memref_squeeze %103 : memref<1x1x128xf32, #tpu.memory_space<any>> -> memref<1x128xf32, #tpu.memory_space<any>>
    %c6_i32_65 = arith.constant 6 : i32
    %c0_i32_66 = arith.constant 0 : i32
    %105 = tpu.memref_slice %arg4[%c6_i32_65, %c0_i32_66] : memref<8x128xf32, #tpu.memory_space<vmem>> -> memref<1x128xf32, #tpu.memory_space<vmem>>
    %106 = tpu.memref_slice %arg5[%c6_i32_63] : memref<8x!tpu.dma_semaphore, #tpu.memory_space<semaphore_mem>> -> memref<1x!tpu.dma_semaphore, #tpu.memory_space<semaphore_mem>>
    %107 = tpu.memref_squeeze %106 : memref<1x!tpu.dma_semaphore, #tpu.memory_space<semaphore_mem>> -> memref<!tpu.dma_semaphore, #tpu.memory_space<semaphore_mem>>
    tpu.wait_dma2 semaphore(%107 : memref<!tpu.dma_semaphore, #tpu.memory_space<semaphore_mem>>) src(%104 : memref<1x128xf32, #tpu.memory_space<any>>) dst(%105 : memref<1x128xf32, #tpu.memory_space<vmem>>)
    %c7_i32_67 = arith.constant 7 : i32
    %c0_i32_68 = arith.constant 0 : i32
    %108 = tpu.memref_slice %arg2[%65, %67, %c0_i32_68] : memref<10x16x128xf32, #tpu.memory_space<any>> -> memref<1x1x128xf32, #tpu.memory_space<any>>
    %109 = tpu.memref_squeeze %108 : memref<1x1x128xf32, #tpu.memory_space<any>> -> memref<1x128xf32, #tpu.memory_space<any>>
    %c7_i32_69 = arith.constant 7 : i32
    %c0_i32_70 = arith.constant 0 : i32
    %110 = tpu.memref_slice %arg4[%c7_i32_69, %c0_i32_70] : memref<8x128xf32, #tpu.memory_space<vmem>> -> memref<1x128xf32, #tpu.memory_space<vmem>>
    %111 = tpu.memref_slice %arg5[%c7_i32_67] : memref<8x!tpu.dma_semaphore, #tpu.memory_space<semaphore_mem>> -> memref<1x!tpu.dma_semaphore, #tpu.memory_space<semaphore_mem>>
    %112 = tpu.memref_squeeze %111 : memref<1x!tpu.dma_semaphore, #tpu.memory_space<semaphore_mem>> -> memref<!tpu.dma_semaphore, #tpu.memory_space<semaphore_mem>>
    tpu.wait_dma2 semaphore(%112 : memref<!tpu.dma_semaphore, #tpu.memory_space<semaphore_mem>>) src(%109 : memref<1x128xf32, #tpu.memory_space<any>>) dst(%110 : memref<1x128xf32, #tpu.memory_space<vmem>>)
    %c0 = arith.constant 0 : index
    %c0_71 = arith.constant 0 : index
    %113 = vector.load %arg4[%c0, %c0_71] : memref<8x128xf32, #tpu.memory_space<vmem>>, vector<8x128xf32>
    %c0_72 = arith.constant 0 : index
    %c0_73 = arith.constant 0 : index
    %114 = vector.load %arg3[%c0_72, %c0_73] : memref<8x128xf32, #tpu.memory_space<vmem>>, vector<8x128xf32>
    tpu.vector_store %arg3[%c0_72, %c0_73], %113 {strides = array<i32>} : memref<8x128xf32, #tpu.memory_space<vmem>>, vector<8x128xf32>,
    return
  }
  func.func @transform_1(%arg0: i32, %arg1: memref<16xi32, #tpu.memory_space<smem>>) -> (i32, i32) {
    %c0_i32 = arith.constant 0 : i32
    %c0_i32_0 = arith.constant 0 : i32
    return %arg0, %c0_i32 : i32, i32
  }
}

</mosaic_0001>

<bundles_post_ra>
// kernel: tpu_custom_call.1
= control target key start
LH: loop header
LB: loop body
LE: loop exit
PB: predicated region body
PF: predicated region fallthrough
CT: control target
= control target key end

     0   :  { %s730_s12 = smov [#allocation5]   ;;  %s931_s0 = inlined_call_operand.hbm [shape: s32[16], index: 0, kind: input, shape index: {}]   ;;  %s932_s1 = inlined_call_operand.hbm [shape: f32[10,16,128], index: 1, kind: input, shape index: {}]   ;;  %s933_s2 = inlined_call_operand.hbm [shape: f32[16,128], index: 2, kind: output, shape index: {}]  }
   0x1   :  { %s8_s11 = sshll.u32 %s931_s0, 4  ;;  %s9_s11 = int_to_ptr.hbm [resolvable:$true] %s8_s11 }
   0x2   :  { %11 = dma.hbm_to_smem %s9_s11, 16, %s730_s12, [#allocation4] }
   0x3   :  { %696 = dma.done.wait [#allocation4], 16 }
   0x4   :  { %697 = vsyncadd [#allocation4], 4294967280 }
   0x5   :  { %14 = sfence }
   0x6   :  { %15 = vsyncpa [#allocation7], 0 }
   0x7   :  { %17 = vsyncpa [#allocation7 + $0x1], 0  ;;  %s757_s13 = smov 0   ;;  %s759_s14 = smov 0  }
   0x8   :  { %s761_s15 = smov 0  }
   0x9 LB: > { %s387_s0 = sadd.s32 4294967295, %s728_s15   ;;  %s774_s16 = sadd.s32 1, %s728_s15   ;;  %s728_s15 = sphi %s761_s15, %s938_s15   ;;  %s724_s14 = sphi %s759_s14, %s937_s14   ;;  %s720_s13 = sphi %s757_s13, %s936_s13  }
   0xa   : > { %s26_s17 = ssub.s32 %s728_s15, %s774_s16  ;;  %s29_s18 = sadd.s32 1, %s724_s14 }
   0xb   : > { %p27_p0 = scmp.eq.s32.totalorder %s26_s17, 0  ;;  %p388_p1 = scmp.ne.s32.totalorder %s26_s17, 0 }
   0xc   : > { %p33_p2 = scmp.eq.s32.totalorder %s728_s15, 1  ;;  %p38_p3 = scmp.ne.s32.totalorder %s724_s14, %s720_s13 }
   0xd   : > { %s783_s19 = scalar_select %p27_p0, %s724_s14, %s29_s18  }
   0xe   : > { %p785_p4 = por %p388_p1, %p33_p2  ;;  %p39_p5 = scmp.eq.s32.totalorder %s387_s0, 1 }
   0xf   : > { %p389_p7 = scmp.ge.s32.totalorder %s728_s15, 2 }
  0x10   : > { %p789_p6 = por %p39_p5, %p38_p3  ;;  %s53_s22 = sand.u32 (!%p389_p7), 1, %s724_s14  }
  0x11   : > { %48 = sbr.rel (%p389_p7) target bundleno = 173 (0xad), region = 12  ;;  %s796_s23 = sshll.u32 (!%p389_p7), %s728_s15, 3 }
  0x12   : > { %s800_s24 = sshll.u32 (!%p389_p7), %s53_s22, 3  ;;  %p57_p8 = scmp.lt.s32.totalorder (!%p389_p7), %s796_s23, 9 }
  0x13   : > { %s59_s25 = sld [smem:[#allocation5 + %s796_s23]] (!%p389_p7)  ;;  %s76_s27 = sadd.s32 (!%p389_p7), 1, %s796_s23 }
  0x14   : > { %s731_s29 = smov (!%p389_p7), [#allocation2]   ;;  %p77_p9 = scmp.lt.s32.totalorder (!%p389_p7), %s76_s27, 9 }
  0x15   : > { %s72_s30 = sshll.u32 (!%p389_p7), %s731_s29, 4  ;;  %s79_s3 = sld [smem:[#allocation5 + %s76_s27]] (!%p389_p7)  ;;  %s73_s30 = int_to_ptr.vmem [resolvable:$true] %s72_s30 }
  0x16   : > { %s58_s26 = scalar_select %p57_p8, %s796_s23, 9 }
  0x17   : > { %s732_s5 = smov [#allocation2 + $0x1]   ;;  %s98_s11 = sadd.s32 2, %s796_s23 }
  0x18   : > { %s392_s28 = sshll.u32 %s58_s26, 4  ;;  %s806_s6 = sshll.u32 %s732_s5, 4  ;;  %s95_s6 = int_to_ptr.vmem [resolvable:$true] %s806_s6 }
  0x19   : > { %s61_s4 = sadd.s32 %s392_s28, %s59_s25  ;;  %p99_p10 = scmp.lt.s32.totalorder %s98_s11, 9 }
  0x1a   : > { %s62_s9 = scalar_lea.hbm %s932_s1, %s61_s4  ;;  %s816_s25 = scalar_lea.hbm %s932_s1, 160 }
  0x1b   : > { %s70_s10 = sshll.u32 %s62_s9, 4  ;;  %s71_s10 = int_to_ptr.hbm [resolvable:$true] %s70_s10 }
  0x1c   : > { %s464_s12 = sshra.s32 %s71_s10, 4  ;;  %s465_s12 = int_to_ptr.hbm [resolvable:$true] %s464_s12 }
  0x1d   : > { %s466_s0 = scalar_lea.hbm %s465_s12, 1  ;;  %p469_p12 = scmp.lt.s32.totalorder %s465_s12, %s932_s1 }
  0x1e   : > { %p467_p11 = scmp.ne.s32.totalorder %s465_s12, %s466_s0  ;;  %p470_p13 = scmp.lt.s32.totalorder %s816_s25, %s466_s0 }
  0x20   : > { %p471_p0 = por %p470_p13, %p469_p12 }
  0x22   : > { %p472_p1 = pnand %p471_p0, %p467_p11 }
  0x24   : > { %475 = shalt.err (!%p472_p1)  }
  0x25   : > { %75 = dma.hbm_to_vmem [thread:$0]  %s71_s10, 16, %s73_s30, [#allocation3] }
  0x26   : > { %s940_s27 = smov (!%p77_p9, %s76_s27), 9  ;;  %s101_s5 = sld [smem:[#allocation5 + %s98_s11]] }
  0x27   : > { %s100_s29 = scalar_select %p99_p10, %s98_s11, 9 }
  0x28   : > { %s393_s4 = sshll.u32 %s940_s27, 4  ;;  %s733_s28 = smov [#allocation2 + $0x2]  }
  0x29   : > { %s81_s7 = sadd.s32 %s393_s4, %s79_s3  ;;  %s394_s8 = sshll.u32 %s100_s29, 4 }
  0x2a   : > { %s82_s18 = scalar_lea.hbm %s932_s1, %s81_s7  ;;  %s826_s12 = sshll.u32 %s733_s28, 4  ;;  %s117_s12 = int_to_ptr.vmem [resolvable:$true] %s826_s12 }
  0x2b   : > { %s92_s26 = sshll.u32 %s82_s18, 4  ;;  %s93_s26 = int_to_ptr.hbm [resolvable:$true] %s92_s26 }
  0x2c   : > { %s488_s30 = sshra.s32 %s93_s26, 4  ;;  %s489_s30 = int_to_ptr.hbm [resolvable:$true] %s488_s30 }
  0x2d   : > { %s490_s10 = scalar_lea.hbm %s489_s30, 1  ;;  %p493_p3 = scmp.lt.s32.totalorder %s489_s30, %s932_s1 }
  0x2e   : > { %p491_p2 = scmp.ne.s32.totalorder %s489_s30, %s490_s10  ;;  %p494_p5 = scmp.lt.s32.totalorder %s816_s25, %s490_s10 }
  0x30   : > { %p495_p7 = por %p494_p5, %p493_p3 }
  0x32   : > { %p496_p8 = pnand %p495_p7, %p491_p2 }
  0x34   : > { %499 = shalt.err (!%p496_p8)  }
  0x35   : > { %97 = dma.hbm_to_vmem [thread:$0]  %s93_s26, 16, %s95_s6, [#allocation3 + $0x1] }
  0x36   : > { %s103_s3 = sadd.s32 %s394_s8, %s101_s5  ;;  %s120_s11 = sadd.s32 3, %s796_s23 }
  0x37   : > { %s104_s7 = scalar_lea.hbm %s932_s1, %s103_s3  ;;  %p121_p9 = scmp.lt.s32.totalorder %s120_s11, 9 }
  0x38   : > { %s114_s9 = sshll.u32 %s104_s7, 4  ;;  %s123_s17 = sld [smem:[#allocation5 + %s120_s11]]  ;;  %s115_s9 = int_to_ptr.hbm [resolvable:$true] %s114_s9 }
  0x39   : > { %s512_s18 = sshra.s32 %s115_s9, 4  ;;  %s513_s18 = int_to_ptr.hbm [resolvable:$true] %s512_s18 }
  0x3a   : > { %s514_s28 = scalar_lea.hbm %s513_s18, 1  ;;  %p517_p11 = scmp.lt.s32.totalorder %s513_s18, %s932_s1 }
  0x3b   : > { %p515_p10 = scmp.ne.s32.totalorder %s513_s18, %s514_s28  ;;  %p518_p12 = scmp.lt.s32.totalorder %s816_s25, %s514_s28 }
  0x3d   : > { %p519_p13 = por %p518_p12, %p517_p11 }
  0x3f   : > { %p520_p0 = pnand %p519_p13, %p515_p10 }
  0x41   : > { %523 = shalt.err (!%p520_p0)  }
  0x42   : > { %119 = dma.hbm_to_vmem [thread:$0]  %s115_s9, 16, %s117_s12, [#allocation3 + $0x2] }
  0x43   : > { %s942_s11 = smov (!%p121_p9, %s120_s11), 9  ;;  %s734_s6 = smov [#allocation2 + $0x3]  }
  0x44   : > { %s138_s5 = sshll.u32 %s734_s6, 4  ;;  %s142_s8 = sadd.s32 4, %s796_s23  ;;  %s139_s5 = int_to_ptr.vmem [resolvable:$true] %s138_s5 }
  0x45   : > { %s395_s26 = sshll.u32 %s942_s11, 4  ;;  %p143_p1 = scmp.lt.s32.totalorder %s142_s8, 9 }
  0x46   : > { %s125_s0 = sadd.s32 %s395_s26, %s123_s17  ;;  %s145_s4 = sld [smem:[#allocation5 + %s142_s8]] }
  0x47   : > { %s126_s29 = scalar_lea.hbm %s932_s1, %s125_s0  ;;  %s735_s18 = smov [#allocation2 + $0x4]  }
  0x48   : > { %s136_s7 = sshll.u32 %s126_s29, 4  ;;  %s848_s12 = sshll.u32 %s735_s18, 4  ;;  %s137_s7 = int_to_ptr.hbm [resolvable:$true] %s136_s7  ;;  %s161_s12 = int_to_ptr.vmem [resolvable:$true] %s848_s12 }
  0x49   : > { %s536_s9 = sshra.s32 %s137_s7, 4  ;;  %s537_s9 = int_to_ptr.hbm [resolvable:$true] %s536_s9 }
  0x4a   : > { %s538_s28 = scalar_lea.hbm %s537_s9, 1  ;;  %p541_p3 = scmp.lt.s32.totalorder %s537_s9, %s932_s1 }
  0x4b   : > { %p539_p2 = scmp.ne.s32.totalorder %s537_s9, %s538_s28  ;;  %p542_p5 = scmp.lt.s32.totalorder %s816_s25, %s538_s28 }
  0x4d   : > { %p543_p7 = por %p542_p5, %p541_p3 }
  0x4f   : > { %p544_p8 = pnand %p543_p7, %p539_p2 }
  0x51   : > { %547 = shalt.err (!%p544_p8)  }
  0x52   : > { %141 = dma.hbm_to_vmem [thread:$0]  %s137_s7, 16, %s139_s5, [#allocation3 + $0x3] }
  0x53   : > { %s944_s8 = smov (!%p143_p1, %s142_s8), 9  ;;  %s164_s11 = sadd.s32 5, %s796_s23 }
  0x54   : > { %s396_s17 = sshll.u32 %s944_s8, 4  ;;  %p165_p9 = scmp.lt.s32.totalorder %s164_s11, 9 }
  0x55   : > { %s147_s6 = sadd.s32 %s396_s17, %s145_s4  ;;  %s167_s26 = sld [smem:[#allocation5 + %s164_s11]] }
  0x56   : > { %s148_s3 = scalar_lea.hbm %s932_s1, %s147_s6  ;;  %s736_s18 = smov [#allocation2 + $0x5]  }
  0x57   : > { %s158_s29 = sshll.u32 %s148_s3, 4  ;;  %s860_s9 = sshll.u32 %s736_s18, 4  ;;  %s159_s29 = int_to_ptr.hbm [resolvable:$true] %s158_s29  ;;  %s183_s9 = int_to_ptr.vmem [resolvable:$true] %s860_s9 }
  0x58   : > { %s560_s5 = sshra.s32 %s159_s29, 4  ;;  %s561_s5 = int_to_ptr.hbm [resolvable:$true] %s560_s5 }
  0x59   : > { %s562_s7 = scalar_lea.hbm %s561_s5, 1  ;;  %p565_p11 = scmp.lt.s32.totalorder %s561_s5, %s932_s1 }
  0x5a   : > { %p563_p10 = scmp.ne.s32.totalorder %s561_s5, %s562_s7  ;;  %p566_p12 = scmp.lt.s32.totalorder %s816_s25, %s562_s7 }
  0x5c   : > { %p567_p13 = por %p566_p12, %p565_p11 }
  0x5e   : > { %p568_p0 = pnand %p567_p13, %p563_p10 }
  0x60   : > { %571 = shalt.err (!%p568_p0)  }
  0x61   : > { %163 = dma.hbm_to_vmem [thread:$0]  %s159_s29, 16, %s161_s12, [#allocation3 + $0x4] }
  0x62   : > { %s946_s11 = smov (!%p165_p9, %s164_s11), 9  ;;  %s186_s8 = sadd.s32 6, %s796_s23 }
  0x63   : > { %s397_s4 = sshll.u32 %s946_s11, 4  ;;  %s189_s17 = sld [smem:[#allocation5 + %s186_s8]] }
  0x64   : > { %s169_s10 = sadd.s32 %s397_s4, %s167_s26  ;;  %p187_p1 = scmp.lt.s32.totalorder %s186_s8, 9 }
  0x65   : > { %s170_s27 = scalar_lea.hbm %s932_s1, %s169_s10  ;;  %s737_s18 = smov [#allocation2 + $0x6]  }
  0x66   : > { %s180_s3 = sshll.u32 %s170_s27, 4  ;;  %s872_s5 = sshll.u32 %s737_s18, 4  ;;  %s181_s3 = int_to_ptr.hbm [resolvable:$true] %s180_s3  ;;  %s205_s5 = int_to_ptr.vmem [resolvable:$true] %s872_s5 }
  0x67   : > { %s875_s12 = sadd.s32 7, %s796_s23  ;;  %s584_s29 = sshra.s32 %s181_s3, 4  ;;  %s585_s29 = int_to_ptr.hbm [resolvable:$true] %s584_s29 }
  0x68   : > { %s586_s7 = scalar_lea.hbm %s585_s29, 1  ;;  %p589_p3 = scmp.lt.s32.totalorder %s585_s29, %s932_s1 }
  0x69   : > { %p587_p2 = scmp.ne.s32.totalorder %s585_s29, %s586_s7  ;;  %p590_p5 = scmp.lt.s32.totalorder %s816_s25, %s586_s7 }
  0x6b   : > { %p591_p7 = por %p590_p5, %p589_p3 }
  0x6d   : > { %p592_p8 = pnand %p591_p7, %p587_p2 }
  0x6f   : > { %595 = shalt.err (!%p592_p8)  }
  0x70   : > { %185 = dma.hbm_to_vmem [thread:$0]  %s181_s3, 16, %s183_s9, [#allocation3 + $0x5] }
  0x71   : > { %s948_s8 = smov (!%p187_p1, %s186_s8), 9  ;;  %s211_s4 = sld [smem:[#allocation5 + %s875_s12]] }
  0x72   : > { %s398_s26 = sshll.u32 %s948_s8, 4  ;;  %p209_p9 = scmp.lt.s32.totalorder %s875_s12, 9 }
  0x73   : > { %s191_s30 = sadd.s32 %s398_s26, %s189_s17 }
  0x74   : > { %s192_s0 = scalar_lea.hbm %s932_s1, %s191_s30 }
  0x75   : > { %s202_s27 = sshll.u32 %s192_s0, 4  ;;  %s203_s27 = int_to_ptr.hbm [resolvable:$true] %s202_s27 }
  0x76   : > { %s608_s18 = sshra.s32 %s203_s27, 4  ;;  %s609_s18 = int_to_ptr.hbm [resolvable:$true] %s608_s18 }
  0x77   : > { %s610_s9 = scalar_lea.hbm %s609_s18, 1  ;;  %p613_p11 = scmp.lt.s32.totalorder %s609_s18, %s932_s1 }
  0x78   : > { %p611_p10 = scmp.ne.s32.totalorder %s609_s18, %s610_s9  ;;  %p614_p12 = scmp.lt.s32.totalorder %s816_s25, %s610_s9 }
  0x7a   : > { %p615_p13 = por %p614_p12, %p613_p11 }
  0x7c   : > { %p616_p0 = pnand %p615_p13, %p611_p10 }
  0x7e   : > { %619 = shalt.err (!%p616_p0)  }
  0x7f   : > { %207 = dma.hbm_to_vmem [thread:$0]  %s203_s27, 16, %s205_s5, [#allocation3 + $0x6] }
  0x80   : > { %s950_s12 = smov (!%p209_p9, %s875_s12), 9  ;;  %s738_s8 = smov [#allocation2 + $0x7]  }
  0x81   : > { %s226_s17 = sshll.u32 %s738_s8, 4  ;;  %s399_s7 = sshll.u32 %s950_s12, 4  ;;  %s227_s17 = int_to_ptr.vmem [resolvable:$true] %s226_s17 }
  0x82   : > { %s213_s28 = sadd.s32 %s399_s7, %s211_s4 }
  0x83   : > { %s214_s30 = scalar_lea.hbm %s932_s1, %s213_s28 }
  0x84   : > { %s224_s10 = sshll.u32 %s214_s30, 4  ;;  %s225_s10 = int_to_ptr.hbm [resolvable:$true] %s224_s10 }
  0x85   : > { %s632_s6 = sshra.s32 %s225_s10, 4  ;;  %s633_s6 = int_to_ptr.hbm [resolvable:$true] %s632_s6 }
  0x86   : > { %s634_s0 = scalar_lea.hbm %s633_s6, 1  ;;  %p637_p2 = scmp.lt.s32.totalorder %s633_s6, %s932_s1 }
  0x87   : > { %p635_p1 = scmp.ne.s32.totalorder %s633_s6, %s634_s0  ;;  %p638_p3 = scmp.lt.s32.totalorder %s816_s25, %s634_s0 }
  0x89   : > { %p639_p5 = por %p638_p3, %p637_p2 }
  0x8b   : > { %p640_p7 = pnand %p639_p5, %p635_p1 }
  0x8d   : > { %643 = shalt.err (!%p640_p7)  }
  0x8e   : > { %229 = dma.hbm_to_vmem [thread:$0]  %s225_s10, 16, %s227_s17, [#allocation3 + $0x7] }
  0x8f   : > { %s55_s12 = scalar_lea.vmem [#allocation6], %s800_s24 }
  0x90   : > { %698 = dma.done.wait [#allocation3], 16 }
  0x91   : > { %699 = vsyncadd [#allocation3], 4294967280 }
  0x92   : > { %700 = dma.done.wait [#allocation3 + $0x1], 16 }
  0x93   : > { %701 = vsyncadd [#allocation3 + $0x1], 4294967280 }
  0x94   : > { %702 = dma.done.wait [#allocation3 + $0x2], 16 }
  0x95   : > { %703 = vsyncadd [#allocation3 + $0x2], 4294967280 }
  0x96   : > { %704 = dma.done.wait [#allocation3 + $0x3], 16 }
  0x97   : > { %705 = vsyncadd [#allocation3 + $0x3], 4294967280 }
  0x98   : > { %706 = dma.done.wait [#allocation3 + $0x4], 16 }
  0x99   : > { %707 = vsyncadd [#allocation3 + $0x4], 4294967280 }
  0x9a   : > { %708 = dma.done.wait [#allocation3 + $0x5], 16 }
  0x9b   : > { %709 = vsyncadd [#allocation3 + $0x5], 4294967280 }
  0x9c   : > { %710 = dma.done.wait [#allocation3 + $0x6], 16 }
  0x9d   : > { %711 = vsyncadd [#allocation3 + $0x6], 4294967280 }
  0x9e   : > { %712 = dma.done.wait [#allocation3 + $0x7], 16 }
  0x9f   : > { %713 = vsyncadd [#allocation3 + $0x7], 4294967280  ;;  %s260_s24 = scalar_lea.hbm %s933_s2, %s796_s23  ;;  %s262_s27 = sshll.u32 %s55_s12, 4  ;;  %v247_v0 = vld [vmem:[#allocation2] sm:$0xff]  ;;  %s263_s27 = int_to_ptr.vmem [resolvable:$true] %s262_s27 }
  0xa0   : > { %s264_s9 = sshll.u32 %s260_s24, 4  ;;  %248 = vst [vmem:[%s55_s12] sm:$0xff] %v247_v0  ;;  %s250_s3 = scalar_lea.sflag [#allocation7], %s53_s22  ;;  %s265_s9 = int_to_ptr.hbm [resolvable:$true] %s264_s9 }
  0xa1   : > { %s670_s29 = sshra.s32 %s265_s9, 4  ;;  %s676_s28 = scalar_lea.hbm %s933_s2, 16  ;;  %s671_s29 = int_to_ptr.hbm [resolvable:$true] %s670_s29 }
  0xa2   : > { %s672_s8 = scalar_lea.hbm %s671_s29, 8  ;;  %p677_p11 = scmp.lt.s32.totalorder %s671_s29, %s933_s2 }
  0xa3   : > { %p673_p8 = scmp.ne.s32.totalorder %s671_s29, %s672_s8  ;;  %p678_p12 = scmp.lt.s32.totalorder %s676_s28, %s672_s8 }
  0xa5   : > { %p674_p9 = pnand %p673_p8, %p785_p4  ;;  %p679_p13 = por %p678_p12, %p677_p11 }
  0xa7   : > { %p675_p10 = pneg %p674_p9 }
  0xa9   : > { %p680_p0 = pnand %p679_p13, %p675_p10 }
  0xab   : > { %683 = shalt.err (!%p680_p0)
}
  0xac   : > { %412 = dma.vmem_to_hbm [thread:$0]  (%p785_p4), %s263_s27, 128, %s265_s9, %s250_s3  }
  0xad PF: > { %p418_p1 = scmp.ge.s32.totalorder %s728_s15, 1  ;;  %s276_s22 = sand.u32 1, %s720_s13  }
  0xae   : > { %s277_s26 = scalar_lea.sflag [#allocation7], %s276_s22 }
  0xaf   : > { %p415_p2 = pnand %p418_p1, %p789_p6 }
  0xb1   : > { %p416_p3 = pneg %p415_p2 }
  0xb3   : > { %715 = dma.done.wait (%p416_p3), %s277_s26, 128  }
  0xb4   : > { %717 = vsyncadd (%p416_p3), %s277_s26, 4294967168  ;;  %p20_p5 = scmp.ge.s32.totalorder %s774_s16, 3   ;;  %s936_s13 = smov %s724_s14 }
  0xb5   : > { %s937_s14 = smov %s783_s19  ;;  %s938_s15 = smov %s774_s16 }
  0xb6   :  { %22 = sbr.rel (!%p20_p5) target bundleno = 9 (0x9), region = 105 }
  0xbb   :  { %283 = vsyncpa [#allocation7], 1 }
  0xbc   :  { %285 = vsyncpa [#allocation7 + $0x1], 1 }
  0xbd   :  { %286 = vsyncmov [#allocation3] }
  0xc0   :  { %s287_s15 = vpop.sfrf %286 }
  0xc1   :  { %p404_p4 = scmp.ne.s32.totalorder %s287_s15, 0 }
  0xc3   :  { %291 = shalt.err (%p404_p4)  }
  0xc4   :  { %293 = vsyncmov [#allocation3 + $0x1] }
  0xc7   :  { %s294_s20 = vpop.sfrf %293 }
  0xc8   :  { %p405_p6 = scmp.ne.s32.totalorder %s294_s20, 0 }
  0xca   :  { %298 = shalt.err (%p405_p6)  }
  0xcb   :  { %300 = vsyncmov [#allocation3 + $0x2] }
  0xce   :  { %s301_s21 = vpop.sfrf %300 }
  0xcf   :  { %p406_p7 = scmp.ne.s32.totalorder %s301_s21, 0 }
  0xd1   :  { %305 = shalt.err (%p406_p7)  }
  0xd2   :  { %307 = vsyncmov [#allocation3 + $0x3] }
  0xd5   :  { %s308_s30 = vpop.sfrf %307 }
  0xd6   :  { %p407_p8 = scmp.ne.s32.totalorder %s308_s30, 0 }
  0xd8   :  { %312 = shalt.err (%p407_p8)  }
  0xd9   :  { %314 = vsyncmov [#allocation3 + $0x4] }
  0xdc   :  { %s315_s16 = vpop.sfrf %314 }
  0xdd   :  { %p408_p9 = scmp.ne.s32.totalorder %s315_s16, 0 }
  0xdf   :  { %319 = shalt.err (%p408_p9)  }
  0xe0   :  { %321 = vsyncmov [#allocation3 + $0x5] }
  0xe3   :  { %s322_s1 = vpop.sfrf %321 }
  0xe4   :  { %p409_p10 = scmp.ne.s32.totalorder %s322_s1, 0 }
  0xe6   :  { %326 = shalt.err (%p409_p10)  }
  0xe7   :  { %328 = vsyncmov [#allocation3 + $0x6] }
  0xea   :  { %s329_s2 = vpop.sfrf %328 }
  0xeb   :  { %p410_p11 = scmp.ne.s32.totalorder %s329_s2, 0 }
  0xed   :  { %333 = shalt.err (%p410_p11)  }
  0xee   :  { %335 = vsyncmov [#allocation3 + $0x7] }
  0xf1   :  { %s336_s13 = vpop.sfrf %335 }
  0xf2   :  { %p411_p12 = scmp.ne.s32.totalorder %s336_s13, 0 }
  0xf4   :  { %340 = shalt.err (%p411_p12)  }

</bundles_post_ra>
